<compile_context>
chip_gen: v7x
topology: tpu7x:2x2x1
jax: 0.10.0
libtpu: 0.0.40
codegen_flags: <defaults>
</compile_context>

<pallas_src>
import functools

import jax
import jax.numpy as jnp
from jax.experimental import pallas as pl
from jax.experimental.pallas import tpu as pltpu


def pia_adapter_attn_kernel(xmean_ref, slabx_ref, brow_ref, slabw_ref,
                            rep_matrix_ref, rep_bias_ref, *, hidden, inv_t):
    H = hidden
    xmean = xmean_ref[...]                                      # (1, C)

    # One fused M=1 MXU matvec.  slab_x columns:
    #   [0:2]       expert_w^T                  -> gate logits (pre-bias)
    #   [2:2+H]     0.5 * conv_A_w^T            -> 0.5 * conv_A(xmean) (pre-bias)
    # brow = [expert_b | 0.5*(conv_A_b + conv_C_b)], so after the add the
    # second block is exactly bias_1 = 0.5*(conv_C_b + conv_A(xmean)).
    fused = (jnp.dot(xmean, slabx_ref[:, 0:2 + H],
                     preferred_element_type=jnp.float32) + brow_ref[...])   # (1, 2+H)

    # 2-way softmax((l0, l1)/t):  w0 = sigmoid((l0 - l1)/t), w1 = 1 - w0.
    d = (fused[:, 1:2] - fused[:, 0:1]) * inv_t                 # (1, 1)
    w0 = 1.0 / (1.0 + jnp.exp(d))                               # (1, 1)

    bias_1 = fused[:, 2:2 + H]                                  # (1, H)

    # Gate-mixed matrix_2, pre-scaled base/delta (base = scale*D, delta = scale*(B-D)).
    # slab_x columns [2+H : 2+2H] = base (C,H), [2+2H : 2+3H] = delta (C,H).
    m2 = slabx_ref[:, 2 + H:2 + 2 * H] + w0 * slabx_ref[:, 2 + 2 * H:2 + 3 * H]   # (C, H)
    # slab_w rows [H:2H] = base^T, [2H:3H] = delta^T  (lane-dense (H, C) copies).
    m2_t = slabw_ref[H:2 * H, :] + w0 * slabw_ref[2 * H:3 * H, :]                 # (H, C)

    m1 = slabw_ref[0:H, :]                                      # (H, C) = 0.5 * conv_C_w
    C = m1.shape[1]
    eye = slabw_ref[3 * H:3 * H + C, :]                         # (C, C) precomputed identity
    bias_2 = (slabw_ref[3 * H + C:3 * H + C + 1, :]
              + w0 * slabw_ref[3 * H + C + 1:3 * H + C + 2, :])  # (1, C)

    # rep_matrix = matrix_2 @ matrix_1 + I
    rep_matrix_ref[...] = jnp.dot(m2, m1, preferred_element_type=jnp.float32) + eye
    # rep_bias (lane-dense row) = bias_1 @ matrix_2^T + bias_2
    rep_bias_ref[...] = jnp.dot(bias_1, m2_t, preferred_element_type=jnp.float32) + bias_2


def pia_adapter_attn(x, params, *, groups=2, scale=1.0, t=10.0):
    """x: (B=1, N, C) float32.  Returns (rep_matrix (C, C), rep_bias (C,))."""
    assert x.shape[0] == 1, "module's bmm / weights[0] path assumes batch size 1"
    f32 = jnp.float32
    xn = x[0].astype(f32)                                       # (N, C)
    C = xn.shape[-1]
    H = params["conv_A_w"].shape[0]
    group_out = C // groups
    group_in = H // groups
    scale = float(scale)

    # Token mean hoisted out of the kernel (plain XLA): the only N-dependent
    # quantity the re-parameterization needs.
    xmean = jnp.mean(xn, axis=0, keepdims=True)                 # (1, C)

    def block_diag(wg):                                         # wg: (C, group_in, 1)
        w2 = wg[:, :, 0]
        mat = jnp.zeros((C, H), f32)
        for i in range(groups):
            mat = mat.at[i * group_out:(i + 1) * group_out,
                         i * group_in:(i + 1) * group_in].set(
                w2[i * group_out:(i + 1) * group_out, :])
        return mat

    m2b = block_diag(params["conv_B_w"])                        # (C, H)
    m2d = block_diag(params["conv_D_w"])                        # (C, H)
    m2_base = scale * m2d                                       # (C, H)
    m2_delta = scale * (m2b - m2d)                              # (C, H)

    # Packed (C, 2+3H) weight slab: [expert_w^T | 0.5*conv_A_w^T | m2_base | m2_delta]
    we_t = params["expert_w"].T.astype(f32)                     # (C, 2)
    half_wa_t = 0.5 * params["conv_A_w"][:, :, 0].T             # (C, H)
    slab_x = jnp.concatenate([we_t, half_wa_t, m2_base, m2_delta], axis=1)

    # Packed (1, 2+H) row-bias slab: [expert_b | 0.5*(conv_A_b + conv_C_b)]
    slab_row = jnp.concatenate(
        [params["expert_b"],
         0.5 * (params["conv_A_b"] + params["conv_C_b"])])[None, :].astype(f32)

    # Packed (3H + C + 2, C) lane-dense slab:
    #   rows [0:H]        0.5 * conv_C_w            (matrix_1)
    #   rows [H:2H]       m2_base^T
    #   rows [2H:3H]      m2_delta^T
    #   rows [3H:3H+C]    identity
    #   row  [3H+C]       scale * conv_D_b          (bias_2 base)
    #   row  [3H+C+1]     scale * (conv_B_b - conv_D_b)   (bias_2 delta)
    m1_half = 0.5 * params["conv_C_w"][:, :, 0]                 # (H, C)
    b2_base = (scale * params["conv_D_b"])[None, :]             # (1, C)
    b2_delta = (scale * (params["conv_B_b"] - params["conv_D_b"]))[None, :]
    slab_w = jnp.concatenate(
        [m1_half, m2_base.T, m2_delta.T, jnp.eye(C, dtype=f32), b2_base, b2_delta],
        axis=0)                                                 # (3H + C + 2, C)

    kernel = functools.partial(pia_adapter_attn_kernel, hidden=H, inv_t=1.0 / float(t))
    vmem = pl.BlockSpec(memory_space=pltpu.MemorySpace.VMEM)
    rep_matrix, rep_bias_row = pl.pallas_call(
        kernel,
        out_shape=(jax.ShapeDtypeStruct((C, C), f32),
                   jax.ShapeDtypeStruct((1, C), f32)),
        in_specs=[vmem] * 4,
        out_specs=(vmem, vmem),
    )(xmean, slab_x, slab_row, slab_w)
    return rep_matrix, rep_bias_row[0]


def reference(x, params, *, groups=2, scale=1.0, t=10.0):
    """Pure-JAX transliteration of the PyTorch forward (for checking)."""
    C = x.shape[-1]
    H = params["conv_A_w"].shape[0]
    group_out, group_in = C // groups, H // groups
    xm = x.mean(axis=1)                                         # (1, C)
    weights = jax.nn.softmax((xm @ params["expert_w"].T + params["expert_b"]) / t, -1)
    xt = jnp.swapaxes(x, 1, 2)                                  # (1, C, N)
    x_ = (jnp.einsum('hc,bcn->bhn', params["conv_A_w"][:, :, 0], xt)
          + params["conv_A_b"][None, :, None]).mean(axis=-1, keepdims=True)  # (1, H, 1)
    matrix_1 = params["conv_C_w"][None, :, :, 0] * 0.5
    bias_1 = (params["conv_C_b"][None, :, None] + x_) * 0.5
    matrix_2 = jnp.zeros((1, C, H), jnp.float32)
    for i in range(groups):
        os_, oe = i * group_out, (i + 1) * group_out
        is_, ie = i * group_in, (i + 1) * group_in
        blk = (params["conv_B_w"][os_:oe, :, 0] * scale * weights[0, 0]
               + params["conv_D_w"][os_:oe, :, 0] * scale * weights[0, 1])
        matrix_2 = matrix_2.at[0, os_:oe, is_:ie].set(blk)
    bias_2 = (params["conv_B_b"] * scale * weights[0, 0]
              + params["conv_D_b"] * scale * weights[0, 1])[None, :, None]
    rep_matrix = jnp.matmul(matrix_2, matrix_1) + jnp.eye(C)
    rep_bias = jnp.matmul(matrix_2, bias_1) + bias_2
    return rep_matrix[0], rep_bias[0, :, 0]


if __name__ == "__main__":
    # Small shapes consistent with the module: in_features=32, hidden_dim=8,
    # groups=2, batch=1 (the bmm path requires it), seq=8.
    C, H, GROUPS, N, B = 32, 8, 2, 8, 1
    SCALE, T = 1.0, 10.0

    key = jax.random.PRNGKey(0)
    ks = jax.random.split(key, 12)

    def xavier(k, shape, fan_in, fan_out):
        bound = (6.0 / (fan_in + fan_out)) ** 0.5
        return jax.random.uniform(k, shape, jnp.float32, -bound, bound)

    # NOTE: the module zero-inits conv_B / conv_D (making the result trivially
    # identity/zero); we use small deterministic random values instead so the
    # kernel's compute path is actually exercised.
    params = {
        "conv_A_w": xavier(ks[0], (H, C, 1), C, H),
        "conv_A_b": jnp.zeros((H,), jnp.float32),
        "conv_C_w": xavier(ks[1], (H, C, 1), C, H),
        "conv_C_b": jnp.zeros((H,), jnp.float32),
        "conv_B_w": 0.02 * jax.random.normal(ks[2], (C, H // GROUPS, 1), jnp.float32),
        "conv_B_b": 0.02 * jax.random.normal(ks[3], (C,), jnp.float32),
        "conv_D_w": 0.02 * jax.random.normal(ks[4], (C, H // GROUPS, 1), jnp.float32),
        "conv_D_b": 0.02 * jax.random.normal(ks[5], (C,), jnp.float32),
        "expert_w": xavier(ks[6], (2, C), C, 2),
        "expert_b": 0.01 * jax.random.normal(ks[7], (2,), jnp.float32),
    }

    x = jax.random.normal(ks[8], (B, N, C), jnp.float32)
    question_mask = jnp.ones((B, N), jnp.float32)  # unused by the forward pass

    rep_matrix, rep_bias = pia_adapter_attn(x, params, groups=GROUPS, scale=SCALE, t=T)
    jax.block_until_ready((rep_matrix, rep_bias))

    ref_matrix, ref_bias = reference(x, params, groups=GROUPS, scale=SCALE, t=T)
    assert rep_matrix.shape == (C, C) and rep_bias.shape == (C,)
    assert jnp.allclose(rep_matrix, ref_matrix, atol=1e-5, rtol=1e-5)
    assert jnp.allclose(rep_bias, ref_bias, atol=1e-5, rtol=1e-5)

    print("KERNEL_OK")
</pallas_src>

<mosaic_0001>
module attributes {stable_mosaic.version = 11 : i64} {
  func.func @pia_adapter_attn_kernel(%arg0: memref<1x32xf32, #tpu.memory_space<vmem>>, %arg1: memref<32x26xf32, #tpu.memory_space<vmem>>, %arg2: memref<1x10xf32, #tpu.memory_space<vmem>>, %arg3: memref<58x32xf32, #tpu.memory_space<vmem>>, %arg4: memref<32x32xf32, #tpu.memory_space<vmem>>, %arg5: memref<1x32xf32, #tpu.memory_space<vmem>>) attributes {dimension_semantics = [], scalar_prefetch = 0 : i64, scratch_operands = 0 : i64, tpu.core_type = #tpu.core_type<tc>} {
    %c0 = arith.constant 0 : index
    %c0_0 = arith.constant 0 : index
    %0 = vector.load %arg0[%c0, %c0_0] : memref<1x32xf32, #tpu.memory_space<vmem>>, vector<1x32xf32>
    %c0_1 = arith.constant 0 : index
    %c0_2 = arith.constant 0 : index
    %1 = vector.load %arg1[%c0_1, %c0_2] : memref<32x26xf32, #tpu.memory_space<vmem>>, vector<32x10xf32>
    %cst = arith.constant dense<0.000000e+00> : vector<1x10xf32>
    %2 = tpu.matmul %0, %1, %cst {dimension_numbers = #tpu.dot_dimension_numbers<[1], [0], [0], [1], [0, 0, 1, 1], [], []>} : vector<1x32xf32>, vector<32x10xf32>, vector<1x10xf32> -> vector<1x10xf32>
    %c0_3 = arith.constant 0 : index
    %c0_4 = arith.constant 0 : index
    %3 = vector.load %arg2[%c0_3, %c0_4] : memref<1x10xf32, #tpu.memory_space<vmem>>, vector<1x10xf32>
    %4 = arith.addf %2, %3 : vector<1x10xf32>
    %5 = vector.extract_strided_slice %4 {offsets = [0, 1], sizes = [1, 1], strides = [1, 1]} : vector<1x10xf32> to vector<1x1xf32>
    %6 = vector.extract_strided_slice %4 {offsets = [0, 0], sizes = [1, 1], strides = [1, 1]} : vector<1x10xf32> to vector<1x1xf32>
    %7 = arith.subf %5, %6 : vector<1x1xf32>
    %cst_5 = arith.constant 1.000000e-01 : f32
    %8 = vector.broadcast %cst_5 : f32 to vector<1x1xf32>
    %9 = arith.mulf %7, %8 : vector<1x1xf32>
    %10 = math.exp %9 : vector<1x1xf32>
    %cst_6 = arith.constant 1.000000e+00 : f32
    %11 = vector.broadcast %cst_6 : f32 to vector<1x1xf32>
    %12 = arith.addf %11, %10 : vector<1x1xf32>
    %cst_7 = arith.constant 1.000000e+00 : f32
    %13 = vector.broadcast %cst_7 : f32 to vector<1x1xf32>
    %14 = arith.divf %13, %12 : vector<1x1xf32>
    %15 = vector.extract_strided_slice %4 {offsets = [0, 2], sizes = [1, 8], strides = [1, 1]} : vector<1x10xf32> to vector<1x8xf32>
    %c0_8 = arith.constant 0 : index
    %c10 = arith.constant 10 : index
    %16 = vector.load %arg1[%c0_8, %c10] : memref<32x26xf32, #tpu.memory_space<vmem>>, vector<32x8xf32>
    %c0_9 = arith.constant 0 : index
    %c18 = arith.constant 18 : index
    %17 = vector.load %arg1[%c0_9, %c18] : memref<32x26xf32, #tpu.memory_space<vmem>>, vector<32x8xf32>
    %18 = vector.broadcast %14 : vector<1x1xf32> to vector<32x8xf32>
    %19 = arith.mulf %18, %17 : vector<32x8xf32>
    %20 = arith.addf %16, %19 : vector<32x8xf32>
    %c8 = arith.constant 8 : index
    %c0_10 = arith.constant 0 : index
    %21 = vector.load %arg3[%c8, %c0_10] : memref<58x32xf32, #tpu.memory_space<vmem>>, vector<8x32xf32>
    %c16 = arith.constant 16 : index
    %c0_11 = arith.constant 0 : index
    %22 = vector.load %arg3[%c16, %c0_11] : memref<58x32xf32, #tpu.memory_space<vmem>>, vector<8x32xf32>
    %23 = vector.broadcast %14 : vector<1x1xf32> to vector<8x32xf32>
    %24 = arith.mulf %23, %22 : vector<8x32xf32>
    %25 = arith.addf %21, %24 : vector<8x32xf32>
    %c0_12 = arith.constant 0 : index
    %c0_13 = arith.constant 0 : index
    %26 = vector.load %arg3[%c0_12, %c0_13] : memref<58x32xf32, #tpu.memory_space<vmem>>, vector<8x32xf32>
    %c24 = arith.constant 24 : index
    %c0_14 = arith.constant 0 : index
    %27 = vector.load %arg3[%c24, %c0_14] : memref<58x32xf32, #tpu.memory_space<vmem>>, vector<32x32xf32>
    %c56 = arith.constant 56 : index
    %c0_15 = arith.constant 0 : index
    %28 = vector.load %arg3[%c56, %c0_15] : memref<58x32xf32, #tpu.memory_space<vmem>>, vector<1x32xf32>
    %c57 = arith.constant 57 : index
    %c0_16 = arith.constant 0 : index
    %29 = vector.load %arg3[%c57, %c0_16] : memref<58x32xf32, #tpu.memory_space<vmem>>, vector<1x32xf32>
    %30 = vector.broadcast %14 : vector<1x1xf32> to vector<1x32xf32>
    %31 = arith.mulf %30, %29 : vector<1x32xf32>
    %32 = arith.addf %28, %31 : vector<1x32xf32>
    %cst_17 = arith.constant dense<0.000000e+00> : vector<32x32xf32>
    %33 = tpu.matmul %20, %26, %cst_17 {dimension_numbers = #tpu.dot_dimension_numbers<[1], [0], [0], [1], [0, 0, 1, 1], [], []>} : vector<32x8xf32>, vector<8x32xf32>, vector<32x32xf32> -> vector<32x32xf32>
    %34 = arith.addf %33, %27 : vector<32x32xf32>
    %c0_18 = arith.constant 0 : index
    %c0_19 = arith.constant 0 : index
    %35 = vector.load %arg4[%c0_18, %c0_19] : memref<32x32xf32, #tpu.memory_space<vmem>>, vector<32x32xf32>
    tpu.vector_store %arg4[%c0_18, %c0_19], %34 {strides = array<i32>} : memref<32x32xf32, #tpu.memory_space<vmem>>, vector<32x32xf32>,
    %cst_20 = arith.constant dense<0.000000e+00> : vector<1x32xf32>
    %36 = tpu.matmul %15, %25, %cst_20 {dimension_numbers = #tpu.dot_dimension_numbers<[1], [0], [0], [1], [0, 0, 1, 1], [], []>} : vector<1x8xf32>, vector<8x32xf32>, vector<1x32xf32> -> vector<1x32xf32>
    %37 = arith.addf %36, %32 : vector<1x32xf32>
    %c0_21 = arith.constant 0 : index
    %c0_22 = arith.constant 0 : index
    %38 = vector.load %arg5[%c0_21, %c0_22] : memref<1x32xf32, #tpu.memory_space<vmem>>, vector<1x32xf32>
    tpu.vector_store %arg5[%c0_21, %c0_22], %37 {strides = array<i32>} : memref<1x32xf32, #tpu.memory_space<vmem>>, vector<1x32xf32>,
    return
  }
}

</mosaic_0001>

<bundles_post_ra>
// kernel: tpu_custom_call.1
= control target key start
LH: loop header
LB: loop body
LE: loop exit
PB: predicated region body
PF: predicated region fallthrough
CT: control target
= control target key end

     0   :  { %11 = vsyncpa [#allocation3], 0  ;;  %v492_v3 = vmov 0.0|0.0   ;;  %vm493_vm0 = vmmov 0   ;;  %v494_v6 = vmov 0.0   ;;  %s623_s0 = inlined_call_operand.vmem [shape: f32[1,32], index: 0, kind: input, shape index: {}]   ;;  %s624_s1 = inlined_call_operand.vmem [shape: f32[32,26], index: 1, kind: input, shape index: {}]   ;;  %s625_s2 = inlined_call_operand.vmem [shape: f32[1,10], index: 2, kind: input, shape index: {}]   ;;  %s626_s3 = inlined_call_operand.vmem [shape: f32[58,32], index: 3, kind: input, shape index: {}]   ;;  %s627_s4 = inlined_call_operand.hbm [shape: f32[32,32], index: 4, kind: output, shape index: {0}]   ;;  %s628_s5 = inlined_call_operand.hbm [shape: f32[1,32], index: 5, kind: output, shape index: {1}]  }
   0x1   :  { %v22_v0 = vld [vmem:[%s624_s1] sm:$0xff]  ;;  %v23_v1 = vld [vmem:[%s624_s1 + $0x8] sm:$0xff]  ;;  %v24_v2 = vld [vmem:[%s624_s1 + $0x10] sm:$0xff]  ;;  %417 = vmatprep.subr.bf16.mxu0 %v492_v3  ;;  %401 = vmatprep.mubr.msk.f32.mxu0 %vm493_vm0, %v494_v6 }
   0x2   :  { %v418_v4 = vpack.c.bf16 %v23_v1, %v22_v0  ;;  %v25_v5 = vld [vmem:[%s624_s1 + $0x18] sm:$0xff] }
   0x3   :  { %12 = vsyncpa [#allocation5], 0  ;;  %v421_v7 = vpack.c.bf16 %v25_v5, %v24_v2  ;;  %v21_v8 = vld [vmem:[%s623_s0] sm:$0x1]  ;;  %vm27_vm1 = vcmask 261120   ;;  %s495_s1 = smov 1  }
   0x4   :  { %419 = vmatpush3.bf16.msra.mxu0 %v418_v4  ;;  %v26_v9 = vld [vmem:[%s625_s2] sm:$0x1]  ;;  %s496_s0 = smov 127   ;;  %v497_v24 = vmov 1   ;;  %s498_s2 = smov 120   ;;  %v143_v36 = vld [vmem:[%s626_s3 + $0x10] sm:$0xff] }
   0x5   :  { %420 = vmatprep.subr.bf16.mxu0 %v492_v3  ;;  %438 = vset.pattern.permute.xlu1 %v497_v24  ;;  %v146_v27 = vld [vmem:[%s626_s3] sm:$0xff]  ;;  %s499_s8 = smov 118   ;;  %s500_s9 = smov 126   ;;  %vm171_vm2 = vcmask 64512   ;;  %v142_v39 = vld [vmem:[%s626_s3 + $0x8] sm:$0xff]  ;;  %v147_v46 = vld [vmem:[%s626_s3 + $0x18] sm:$0xff] }
   0x6   :  { %439 = vset.pattern.permute.xlu0 %v497_v24  ;;  %404 = vmatprep.subr.mxu1 %v146_v27  ;;  %v148_v45 = vld [vmem:[%s626_s3 + $0x20] sm:$0xff]  ;;  %v152_v47 = vld [vmem:[%s626_s3 + $0x39] sm:$0x1]  ;;  %v150_v53 = vld [vmem:[%s626_s3 + $0x30] sm:$0xff]  ;;  %s501_s24 = smov [#allocation2]   ;;  %s502_s28 = smov [#allocation4]  }
   0x7   :  { %405 = vmatpush3.msra.mxu1 %v146_v27  ;;  %v149_v55 = vld [vmem:[%s626_s3 + $0x28] sm:$0xff]  ;;  %s350_s25 = sshll.u32 %s501_s24, 4  ;;  %v151_v57 = vld [vmem:[%s626_s3 + $0x38] sm:$0x1]  ;;  %s363_s29 = sshll.u32 %s502_s28, 4  ;;  %vm343_vm3 = vcmask 253952   ;;  %s351_s25 = int_to_ptr.vmem [resolvable:$true] %s350_s25  ;;  %s590_s29 = int_to_ptr.vmem [resolvable:$true] %s363_s29 }
   0x8   :  { %422 = vmatpush3.bf16.msra.mxu0 %v421_v7  ;;  %412 = vmatprep.subr.mxu1 %v494_v6  ;;  %p449_p1 = scmp.lt.s32.totalorder %s351_s25, %s351_s25 }
   0xb   :  { %402 = vmatmul.mubr.msk.f32.vlgmr.msra.gmra.mrb[0].mxu0 %vm27_vm1, %v21_v8 }
  0xde   :  { %v97_v10 = vpop.f32.mrb[0].mxu0 }
  0xdf   :  { %v98_v11 = vadd.f32 %v97_v10, %v26_v9  ;;  %v403_v12 = vpop.f32.mrb[1].mxu0 }
  0xe1   :  { %102 = vrot.lane.b32.xlu0 %v98_v11, %s495_s1  ;;  %s444_s1 = scalar_lea.vmem %s351_s25, 512 }
  0xe2   :  { %p445_p0 = scmp.ne.s32.totalorder %s351_s25, %s444_s1  ;;  %p450_p2 = scmp.lt.s32.totalorder %s444_s1, %s444_s1 }
  0xe4   :  { %p451_p3 = por %p450_p2, %p449_p1 }
  0xe6   :  { %p452_p4 = pnand %p451_p3, %p445_p0 }
 0x153   :  { %v103_v13 = vpop.permute.xlu0 %102 }
 0x154   :  { %v105_v14 = vsub.f32 %v98_v11, %v103_v13 }
 0x156   :  { %v106_v15 = vmul.f32 0.1, %v105_v14 }
 0x158   :  { %v107_v16 = vmul.f32 1.442695, %v106_v15 }
 0x15a   :  { %440 = vpow2.f32 %v107_v16 }
 0x164   :  { %v441_v17 = vpop.eup %440 }
 0x165   :  { %v109_v18 = vadd.f32 1.0, %v441_v17 }
 0x167   :  { %442 = vrcp.f32 %v109_v18 }
 0x171   :  { %v443_v19 = vpop.eup %442 }
 0x172   :  { %113 = vrot.lane.b32.xlu0 %v443_v19, %s496_s0 }
 0x1e4   :  { %v114_v20 = vpop.permute.xlu0 %113 }
 0x1e5   :  { %423 = vpush %v114_v20 }
 0x216   :  { %s424_s30 = spop %423 }
 0x217   :  { %v116_v21 = vstv %s424_s30 }
 0x218   :  { %v120_v22 = vmul.f32 %v116_v21, %v24_v2  ;;  %v118_v23 = vmul.f32 %v116_v21, %v22_v0  ;;  %v119_v25 = vmul.f32 %v116_v21, %v23_v1  ;;  %v121_v26 = vmul.f32 %v116_v21, %v25_v5 }
 0x219   :  { %v144_v37 = vmul.f32 %v143_v36, %v116_v21 }
 0x21a   :  { %130 = vrot.lane.b32.xlu0 %v120_v22, %s498_s2  ;;  %126 = vrot.lane.b32.xlu1 %v118_v23, %s498_s2 }
 0x21b   :  { %v145_v42 = vadd.f32 %v144_v37, %v142_v39 }
 0x21e   :  { %128 = vrot.lane.b32.xlu1 %v119_v25, %s498_s2 }
 0x222   :  { %132 = vrot.lane.b32.xlu1 %v121_v26, %s498_s2 }
 0x28c   :  { %v127_v28 = vpop.permute.xlu1 %126  ;;  %v131_v30 = vpop.permute.xlu0 %130 }
 0x28d   :  { %v138_v29 = vadd.f32 %v127_v28, %v22_v0  ;;  %v140_v32 = vadd.f32 %v131_v30, %v24_v2 }
 0x28f   :  { %163 = vrot.lane.b32.xlu0 %v138_v29, %s499_s8 }
 0x290   :  { %v129_v31 = vpop.permute.xlu1 %128 }
 0x291   :  { %v139_v33 = vadd.f32 %v129_v31, %v23_v1 }
 0x293   :  { %167 = vrot.lane.b32.xlu0 %v140_v32, %s499_s8  ;;  %165 = vrot.lane.b32.xlu1 %v139_v33, %s499_s8 }
 0x294   :  { %v133_v34 = vpop.permute.xlu1 %132 }
 0x295   :  { %v141_v35 = vadd.f32 %v133_v34, %v25_v5 }
 0x297   :  { %269 = vrot.lane.b32.xlu0 %v98_v11, %s500_s9  ;;  %169 = vrot.lane.b32.xlu1 %v141_v35, %s499_s8 }
 0x29b   :  { %154 = vperm.xlu1 %438, %v443_v19  }
 0x301   :  { %v164_v38 = vpop.permute.xlu0 %163 }
 0x302   :  { %406 = vmatprep.mubr.msk.f32.mxu1 %vm171_vm2, %v164_v38 }
 0x305   :  { %v168_v40 = vpop.permute.xlu0 %167  ;;  %v166_v41 = vpop.permute.xlu1 %165 }
 0x306   :  { %407 = vmatmul.mubr.msk.f32.vlgmr.msra.gmra.mrb[0].mxu1 %vm171_vm2, %v166_v41 }
 0x307   :  { %413 = vmatpush3.msra.mxu1 %v145_v42  ;;  %409 = vmatprep.mubr.msk.f32.mxu1 %vm171_vm2, %v168_v40 }
 0x309   :  { %v170_v43 = vpop.permute.xlu1 %169  ;;  %v270_v44 = vpop.permute.xlu0 %269 }
 0x30a   :  { %410 = vmatmul.mubr.msk.f32.gmra.mrb[2].mxu1 %vm171_vm2, %v170_v43 }
 0x30b   :  { %414 = vmatprep.mubr.msk.f32.mxu1 %vm493_vm0, %v494_v6 }
 0x30e   :  { %415 = vmatmul.mubr.msk.f32.vlgmr.msra.gmra.mrb[4].mxu1 %vm171_vm2, %v270_v44 }
 0x31a   :  { %v155_v48 = vpop.permute.xlu1 %154 }
 0x31b   :  { %v157_v54 = vmul.f32 %v155_v48, %v152_v47 }
 0x31d   :  { %v158_v61 = vadd.f32 %v157_v54, %v151_v57 }
 0x3d9   :  { %v408_v49 = vpop.f32.mrb[0].mxu1 }
 0x3da   :  { %v252_v50 = vadd.f32 %v408_v49, %v148_v45  ;;  %v246_v51 = vpop.f32.mrb[1].mxu1 }
 0x3db   :  { %v247_v52 = vadd.f32 %v246_v51, %v147_v46 }
 0x3dc   :  { %266 = vst.msk [vmem:[#allocation2 + $0x8] sm:$0xff] %vm27_vm1, %v252_v50 }
 0x3dd   :  { %265 = vst.msk [vmem:[#allocation2] sm:$0xff] %vm27_vm1, %v247_v52  ;;  %v411_v56 = vpop.f32.mrb[2].mxu1 }
 0x3de   :  { %v262_v58 = vadd.f32 %v411_v56, %v150_v53  ;;  %v256_v59 = vpop.f32.mrb[3].mxu1 }
 0x3df   :  { %v257_v60 = vadd.f32 %v256_v59, %v149_v55 }
 0x3e0   :  { %268 = vst.msk [vmem:[#allocation2 + $0x18] sm:$0xff] %vm27_vm1, %v262_v58 }
 0x3e1   :  { %267 = vst.msk [vmem:[#allocation2 + $0x10] sm:$0xff] %vm27_vm1, %v257_v60  ;;  %v339_v62 = vpop.f32.mrb[4].mxu1 }
 0x3e2   :  { %v340_v63 = vadd.f32 %v339_v62, %v158_v61  ;;  %v416_v0 = vpop.f32.mrb[5].mxu1 }
 0x3e3   :  { %455 = shalt.err (!%p452_p4)
}
 0x3e4   :  { %s456_s30 = scalar_lea.hbm %s627_s4, 512 }
 0x3e5   :  { %p457_p5 = scmp.ne.s32.totalorder %s627_s4, %s456_s30  ;;  %p460_p6 = scmp.lt.u32.totalorder %s456_s30, %s627_s4 }
 0x3e7   :  { %p462_p7 = pnand %p460_p6, %p457_p5 }
 0x3e9   :  { %465 = shalt.err (!%p462_p7)
}
 0x3ea   :  { %s503_s9 = smov 128   ;;  %s504_s10 = smov 8   ;;  %344 = vst.msk [vmem:[#allocation4] sm:$0x1] %vm343_vm3, %v340_v63 }
 0x3eb   :  { %356 = dma.vmem_to_hbm [thread:$0]  %s351_s25, 512, %s627_s4, [#allocation3], %s503_s9, %s503_s9, %s504_s10  }
 0x3ec   :  { %s466_s13 = scalar_lea.vmem %s590_s29, 16  ;;  %s470_s14 = scalar_lea.vmem %s590_s29, 32 }
 0x3ed   :  { %p467_p8 = scmp.ne.s32.totalorder %s590_s29, %s466_s13  ;;  %p471_p9 = scmp.lt.s32.totalorder %s590_s29, %s590_s29 }
 0x3ee   :  { %p472_p10 = scmp.lt.s32.totalorder %s470_s14, %s466_s13 }
 0x3f0   :  { %p473_p11 = por %p472_p10, %p471_p9 }
 0x3f2   :  { %p474_p12 = pnand %p473_p11, %p467_p8 }
 0x3f4   :  { %477 = shalt.err (!%p474_p12)
}
 0x3f5   :  { %s478_s17 = scalar_lea.hbm %s628_s5, 16 }
 0x3f6   :  { %p479_p13 = scmp.ne.s32.totalorder %s628_s5, %s478_s17  ;;  %p482_p0 = scmp.lt.u32.totalorder %s478_s17, %s628_s5 }
 0x3f8   :  { %p484_p1 = pnand %p482_p0, %p479_p13 }
 0x3fa   :  { %487 = shalt.err (!%p484_p1)
}
 0x3fb   :  { %366 = dma.vmem_to_hbm [thread:$0]  %s590_s29, 16, %s628_s5, [#allocation5]  }
 0x3fc   :  { %488 = dma.done.wait [#allocation3], 512  }
 0x3fd   :  { %489 = vsyncadd [#allocation3], 4294966784 }
 0x3fe   :  { %490 = dma.done.wait [#allocation5], 16  }
 0x3ff   :  { %491 = vsyncadd [#allocation5], 4294967280 }
 0x400   :  { %373 = vsyncpa [#allocation3], 1 }
 0x401   :  { %374 = vsyncpa [#allocation5], 1 }

</bundles_post_ra>
